<compile_context>
chip_gen: v7x
topology: tpu7x:2x2x1
jax: 0.10.0
libtpu: 0.0.40
codegen_flags: <defaults>
</compile_context>

<pallas_src>
import functools

import numpy as np
import jax
import jax.numpy as jnp
from jax.experimental import pallas as pl
from jax.experimental.pallas import tpu as pltpu


def _round_up(x, m):
    return ((x + m - 1) // m) * m


# ----------------------------------------------------------------------------
# Pallas kernel: one (b_tile, p_tile) output tile per grid step.
# ----------------------------------------------------------------------------
def _approx_inverse_kernel(energies_ref, dT_ref, neg_a2_ref, b2_ref, out_ref,
                           *, true_inverse: bool, expansion: int):
    # delta[b, p] = |E[b, i_p] - E[b, j_p]| via the +/-1 selector matmul (MXU).
    delta = jnp.abs(
        jnp.dot(energies_ref[...], dT_ref[...],
                preferred_element_type=jnp.float32))
    if true_inverse:
        x = delta + 1e-6
        # EUP vrcp (approx ~2^-12 rel err) + two cheap Newton-Raphson steps
        # -> f32-accurate 1/x while keeping the VALU divide sequence off the
        # critical path (kernel is HBM-write bound).
        y = pl.reciprocal(x, approx=True)
        y = y * (2.0 - x * y)
        y = y * (2.0 - x * y)
        out_ref[...] = y
    else:
        # acc = sum_k beta_k^2 * exp(-alpha_k^2 * delta); -alpha^2 and beta^2
        # are precomputed host-side and live in SMEM.
        acc = b2_ref[0] * jnp.exp(neg_a2_ref[0] * delta)
        for k in range(1, expansion):
            acc = acc + b2_ref[k] * jnp.exp(neg_a2_ref[k] * delta)
        out_ref[...] = acc


# ----------------------------------------------------------------------------
# Wrapper: pad to lane-dense shapes, tile over (P, B), slice padding off.
# ----------------------------------------------------------------------------
def approximate_inverse_pallas(energies, d_T, neg_alpha_sq, beta_sq, *,
                               true_inverse=True,
                               b_tile_max=512, p_tile_max=2048):
    """energies: [B, S] f32; d_T: [S, P] f32 (+/-1 selector);
    neg_alpha_sq / beta_sq: [E] f32 (ignored when true_inverse=True)."""
    energies = jnp.asarray(energies, jnp.float32)
    d_T = jnp.asarray(d_T, jnp.float32)
    neg_alpha_sq = jnp.asarray(neg_alpha_sq, jnp.float32)
    beta_sq = jnp.asarray(beta_sq, jnp.float32)

    B, S = energies.shape
    S2, P = d_T.shape
    assert S2 == S
    expansion = int(neg_alpha_sq.shape[0])

    # Lane-dense padding: P -> multiple of 128 (unmasked vst), B -> multiple of 8.
    b_tile = int(min(b_tile_max, _round_up(B, 8)))
    p_tile = int(min(p_tile_max, _round_up(P, 128)))
    B_pad = _round_up(B, b_tile)
    P_pad = _round_up(P, p_tile)
    if B_pad != B:
        energies = jnp.pad(energies, ((0, B_pad - B), (0, 0)))
    if P_pad != P:
        d_T = jnp.pad(d_T, ((0, 0), (0, P_pad - P)))   # zero cols -> delta = 0

    # Grid: P-tiles outer, B-tiles inner -> each D^T tile is DMA'd once and
    # stays resident while all B-tiles stream past it.
    grid = (P_pad // p_tile, B_pad // b_tile)

    # VMEM budget: double-buffered output + energies + D^T tiles (+ headroom).
    vmem_need = 2 * 4 * (b_tile * p_tile + b_tile * S + S * p_tile)
    vmem_limit = int(min(max(vmem_need * 3 // 2 + (2 << 20), 16 << 20), 64 << 20))

    kernel = functools.partial(_approx_inverse_kernel,
                               true_inverse=true_inverse,
                               expansion=expansion)
    cost = pl.CostEstimate(
        flops=int(2 * B_pad * P_pad * S + 6 * B_pad * P_pad),
        transcendentals=int((1 if true_inverse else expansion) * B_pad * P_pad),
        bytes_accessed=int(4 * (B_pad * S + S * P_pad + B_pad * P_pad)))

    out = pl.pallas_call(
        kernel,
        out_shape=jax.ShapeDtypeStruct((B_pad, P_pad), jnp.float32),
        grid=grid,
        in_specs=[
            pl.BlockSpec((b_tile, S), lambda p, b: (b, 0)),        # energies
            pl.BlockSpec((S, p_tile), lambda p, b: (0, p)),        # D^T (resident over b)
            pl.BlockSpec(memory_space=pltpu.MemorySpace.SMEM),     # -alpha^2
            pl.BlockSpec(memory_space=pltpu.MemorySpace.SMEM),     # beta^2
        ],
        out_specs=pl.BlockSpec((b_tile, p_tile), lambda p, b: (b, p)),
        compiler_params=pltpu.CompilerParams(
            dimension_semantics=("parallel", "parallel"),
            vmem_limit_bytes=vmem_limit),
        cost_estimate=cost,
    )(energies, d_T, neg_alpha_sq, beta_sq)

    return out[:B, :P]


# ----------------------------------------------------------------------------
# Module setup glue (deterministic fit=False buffers, +/-1 selector matrix)
# ----------------------------------------------------------------------------
def build_module(n_states, n_triplets=None):
    mask = np.triu(np.ones((n_states, n_states), dtype=np.int64), 1) == 1
    if n_triplets is not None:
        mask[:n_triplets, n_triplets:] = False
    pairs = np.argwhere(mask)                      # row-major (i, j) pair order
    P = pairs.shape[0]
    D = np.zeros((P, n_states), dtype=np.float32)
    D[np.arange(P), pairs[:, 0]] = 1.0
    D[np.arange(P), pairs[:, 1]] = -1.0
    alpha = np.array([1.13958937, 0.45577329, 2.13002577], dtype=np.float32)
    beta = np.array([1.3428374, 0.74349656, 2.31989616], dtype=np.float32)
    neg_alpha_sq = (-(alpha * alpha)).astype(np.float32)
    beta_sq = (beta * beta).astype(np.float32)
    return (mask, jnp.asarray(D.T), jnp.asarray(neg_alpha_sq),
            jnp.asarray(beta_sq), alpha, beta)


# ----------------------------------------------------------------------------
# Pure-numpy reference (mirrors the PyTorch forward exactly, in f64)
# ----------------------------------------------------------------------------
def reference(energies, mask, alpha, beta, true_inverse):
    e = np.asarray(energies, dtype=np.float64)
    de = e[:, :, None] - e[:, None, :]
    de = np.abs(de[:, mask])
    if true_inverse:
        return 1.0 / (de + 1e-6)
    a2 = (np.asarray(alpha, np.float64) ** 2)[None, None, :]
    b2 = (np.asarray(beta, np.float64) ** 2)[None, None, :]
    return np.sum(b2 * np.exp(-a2 * de[:, :, None]), axis=2)


if __name__ == "__main__":
    key = jax.random.PRNGKey(0)
    k1, k2 = jax.random.split(key)

    # --- case 1: module defaults at toy size (B=4, n_states=8, n_triplets=3) --
    mask, d_T, neg_a2, b2, alpha, beta = build_module(8, 3)     # P = 13
    e1 = jax.random.normal(k1, (4, 8), dtype=jnp.float32)

    out_true = jax.block_until_ready(
        approximate_inverse_pallas(e1, d_T, neg_a2, b2, true_inverse=True))
    np.testing.assert_allclose(np.asarray(out_true),
                               reference(e1, mask, alpha, beta, True),
                               rtol=1e-5, atol=1e-6)

    out_exp = jax.block_until_ready(
        approximate_inverse_pallas(e1, d_T, neg_a2, b2, true_inverse=False))
    np.testing.assert_allclose(np.asarray(out_exp),
                               reference(e1, mask, alpha, beta, False),
                               rtol=1e-5, atol=1e-6)

    # --- case 2: exercise the multi-tile (P, B) grid + resident D^T tile ------
    mask2, d_T2, neg_a22, b22, alpha2, beta2 = build_module(24, None)  # P = 276
    e2 = jax.random.normal(k2, (32, 24), dtype=jnp.float32)

    out2t = jax.block_until_ready(
        approximate_inverse_pallas(e2, d_T2, neg_a22, b22, true_inverse=True,
                                   b_tile_max=8, p_tile_max=128))
    np.testing.assert_allclose(np.asarray(out2t),
                               reference(e2, mask2, alpha2, beta2, True),
                               rtol=1e-5, atol=1e-6)

    out2e = jax.block_until_ready(
        approximate_inverse_pallas(e2, d_T2, neg_a22, b22, true_inverse=False,
                                   b_tile_max=8, p_tile_max=128))
    np.testing.assert_allclose(np.asarray(out2e),
                               reference(e2, mask2, alpha2, beta2, False),
                               rtol=1e-5, atol=1e-6)

    print("KERNEL_OK")
</pallas_src>

<mosaic_0001>
module attributes {stable_mosaic.version = 11 : i64} {
  func.func @_approx_inverse_kernel(%arg0: i32, %arg1: i32, %arg2: memref<8x8xf32, #tpu.memory_space<vmem>>, %arg3: memref<8x128xf32, #tpu.memory_space<vmem>>, %arg4: memref<3xf32, #tpu.memory_space<smem>>, %arg5: memref<3xf32, #tpu.memory_space<smem>>, %arg6: memref<8x128xf32, #tpu.memory_space<vmem>>) attributes {dimension_semantics = [#tpu.dimension_semantics<parallel>, #tpu.dimension_semantics<parallel>], iteration_bounds = array<i64: 1, 1>, scalar_prefetch = 0 : i64, scratch_operands = 0 : i64, tpu.core_type = #tpu.core_type<tc>, window_params = [{transform_indices = @transform_0, window_bounds = array<i64: 8, 8>}, {transform_indices = @transform_1, window_bounds = array<i64: 8, 128>}, {transform_indices = @transform_2, window_bounds = array<i64: 3>}, {transform_indices = @transform_3, window_bounds = array<i64: 3>}, {transform_indices = @transform_4, window_bounds = array<i64: 8, 128>}]} {
    %c0 = arith.constant 0 : index
    %c0_0 = arith.constant 0 : index
    %0 = vector.load %arg2[%c0, %c0_0] : memref<8x8xf32, #tpu.memory_space<vmem>>, vector<8x8xf32>
    %c0_1 = arith.constant 0 : index
    %c0_2 = arith.constant 0 : index
    %1 = vector.load %arg3[%c0_1, %c0_2] : memref<8x128xf32, #tpu.memory_space<vmem>>, vector<8x128xf32>
    %cst = arith.constant dense<0.000000e+00> : vector<8x128xf32>
    %2 = tpu.matmul %0, %1, %cst {dimension_numbers = #tpu.dot_dimension_numbers<[1], [0], [0], [1], [0, 0, 1, 1], [], []>} : vector<8x8xf32>, vector<8x128xf32>, vector<8x128xf32> -> vector<8x128xf32>
    %3 = math.absf %2 : vector<8x128xf32>
    %cst_3 = arith.constant 9.99999997E-7 : f32
    %4 = vector.broadcast %cst_3 : f32 to vector<8x128xf32>
    %5 = arith.addf %3, %4 : vector<8x128xf32>
    %6 = tpu.reciprocal %5 {approx = true} : vector<8x128xf32> -> vector<8x128xf32>
    %7 = arith.mulf %5, %6 : vector<8x128xf32>
    %cst_4 = arith.constant 2.000000e+00 : f32
    %8 = vector.broadcast %cst_4 : f32 to vector<8x128xf32>
    %9 = arith.subf %8, %7 : vector<8x128xf32>
    %10 = arith.mulf %6, %9 : vector<8x128xf32>
    %11 = arith.mulf %5, %10 : vector<8x128xf32>
    %cst_5 = arith.constant 2.000000e+00 : f32
    %12 = vector.broadcast %cst_5 : f32 to vector<8x128xf32>
    %13 = arith.subf %12, %11 : vector<8x128xf32>
    %14 = arith.mulf %10, %13 : vector<8x128xf32>
    %c0_6 = arith.constant 0 : index
    %c0_7 = arith.constant 0 : index
    %15 = vector.load %arg6[%c0_6, %c0_7] : memref<8x128xf32, #tpu.memory_space<vmem>>, vector<8x128xf32>
    tpu.vector_store %arg6[%c0_6, %c0_7], %14 {strides = array<i32>} : memref<8x128xf32, #tpu.memory_space<vmem>>, vector<8x128xf32>,
    return
  }
  func.func @transform_0(%arg0: i32, %arg1: i32) -> (i32, i32) {
    %c0_i32 = arith.constant 0 : i32
    %c0_i32_0 = arith.constant 0 : i32
    return %arg1, %c0_i32 : i32, i32
  }
  func.func @transform_1(%arg0: i32, %arg1: i32) -> (i32, i32) {
    %c0_i32 = arith.constant 0 : i32
    %c0_i32_0 = arith.constant 0 : i32
    return %c0_i32, %arg0 : i32, i32
  }
  func.func @transform_2(%arg0: i32, %arg1: i32) -> i32 {
    %c0_i32 = arith.constant 0 : i32
    %c0_i32_0 = arith.constant 0 : i32
    return %c0_i32 : i32
  }
  func.func @transform_3(%arg0: i32, %arg1: i32) -> i32 {
    %c0_i32 = arith.constant 0 : i32
    %c0_i32_0 = arith.constant 0 : i32
    return %c0_i32 : i32
  }
  func.func @transform_4(%arg0: i32, %arg1: i32) -> (i32, i32) {
    %c0_i32 = arith.constant 0 : i32
    return %arg1, %arg0 : i32, i32
  }
}

</mosaic_0001>

<bundles_post_ra>
// kernel: tpu_custom_call.1
= control target key start
LH: loop header
LB: loop body
LE: loop exit
PB: predicated region body
PF: predicated region fallthrough
CT: control target
= control target key end

     0   :  { %9 = vsyncpa [#allocation3], 0  ;;  %s362_s0 = inlined_call_operand.hbm [shape: f32[8,8], index: 0, kind: input, shape index: {}]   ;;  %s363_s1 = inlined_call_operand.hbm [shape: f32[8,128], index: 1, kind: input, shape index: {}]   ;;  %s364_s2 = inlined_call_operand.vmem [shape: f32[3], index: 2, kind: input, shape index: {}]   ;;  %s365_s3 = inlined_call_operand.vmem [shape: f32[3], index: 3, kind: input, shape index: {}]   ;;  %s366_s4 = inlined_call_operand.hbm [shape: f32[8,128], index: 4, kind: output, shape index: {}]  }
   0x1   :  { %10 = vsyncpa [#allocation7], 0 }
   0x2   :  { %11 = vsyncpa [#allocation5], 0 }
   0x3   :  { %12 = vsyncpa [#allocation10], 0 }
   0x4   :  { %13 = vsyncpa [#allocation4], 0  ;;  %s288_s15 = smov [#allocation2]   ;;  %s289_s17 = smov [#allocation6]  }
   0x5   :  { %s20_s16 = sshll.u32 %s288_s15, 4  ;;  %s30_s18 = sshll.u32 %s289_s17, 4  ;;  %s21_s16 = int_to_ptr.vmem [resolvable:$true] %s20_s16  ;;  %s31_s18 = int_to_ptr.vmem [resolvable:$true] %s30_s18 }
   0x6   :  { %s188_s21 = scalar_lea.hbm %s362_s0, 128 }
   0x7   :  { %p189_p0 = scmp.ne.s32.totalorder %s362_s0, %s188_s21  ;;  %p192_p1 = scmp.lt.u32.totalorder %s188_s21, %s362_s0 }
   0x9   :  { %p194_p2 = pnand %p192_p1, %p189_p0 }
   0xb   :  { %197 = shalt.err (!%p194_p2)
}
   0xc   :  { %s198_s26 = scalar_lea.vmem %s21_s16, 128  ;;  %p203_p4 = scmp.lt.s32.totalorder %s21_s16, %s21_s16 }
   0xd   :  { %p199_p3 = scmp.ne.s32.totalorder %s21_s16, %s198_s26  ;;  %p204_p5 = scmp.lt.s32.totalorder %s198_s26, %s198_s26 }
   0xf   :  { %p205_p6 = por %p204_p5, %p203_p4 }
  0x11   :  { %p206_p7 = pnand %p205_p6, %p199_p3 }
  0x13   :  { %209 = shalt.err (!%p206_p7)
}
  0x14   :  { %23 = dma.hbm_to_vmem [thread:$0]  %s362_s0, 128, %s21_s16, [#allocation3]  }
  0x15   :  { %s210_s5 = scalar_lea.hbm %s363_s1, 128 }
  0x16   :  { %p211_p8 = scmp.ne.s32.totalorder %s363_s1, %s210_s5  ;;  %p214_p9 = scmp.lt.u32.totalorder %s210_s5, %s363_s1 }
  0x18   :  { %p216_p10 = pnand %p214_p9, %p211_p8 }
  0x1a   :  { %219 = shalt.err (!%p216_p10)
}
  0x1b   :  { %s220_s10 = scalar_lea.vmem %s31_s18, 128  ;;  %p225_p12 = scmp.lt.s32.totalorder %s31_s18, %s31_s18 }
  0x1c   :  { %p221_p11 = scmp.ne.s32.totalorder %s31_s18, %s220_s10  ;;  %p226_p13 = scmp.lt.s32.totalorder %s220_s10, %s220_s10 }
  0x1e   :  { %p227_p0 = por %p226_p13, %p225_p12 }
  0x20   :  { %p228_p1 = pnand %p227_p0, %p221_p11 }
  0x22   :  { %231 = shalt.err (!%p228_p1)
}
  0x23   :  { %33 = dma.hbm_to_vmem [thread:$0]  %s363_s1, 128, %s31_s18, [#allocation7]  }
  0x24   :  { %s40_s14 = sshll.u32 %s364_s2, 4  ;;  %s50_s17 = sshll.u32 %s365_s3, 4  ;;  %s41_s14 = int_to_ptr.vmem [resolvable:$true] %s40_s14  ;;  %s51_s17 = int_to_ptr.vmem [resolvable:$true] %s50_s17 }
  0x25   :  { %s232_s19 = scalar_lea.vmem %s41_s14, 16  ;;  %p237_p3 = scmp.lt.s32.totalorder %s41_s14, %s41_s14 }
  0x26   :  { %p233_p2 = scmp.ne.s32.totalorder %s41_s14, %s232_s19  ;;  %p238_p4 = scmp.lt.s32.totalorder %s232_s19, %s232_s19 }
  0x28   :  { %p239_p5 = por %p238_p4, %p237_p3 }
  0x2a   :  { %p240_p6 = pnand %p239_p5, %p233_p2 }
  0x2c   :  { %243 = shalt.err (!%p240_p6)
}
  0x2d   :  { %s290_s20 = smov [#allocation8]   ;;  %s244_s1 = scalar_lea.vmem %s51_s17, 16 }
  0x2e   :  { %43 = dma.vmem_to_smem %s41_s14, 16, %s290_s20, [#allocation5]  }
  0x2f   :  { %p245_p7 = scmp.ne.s32.totalorder %s51_s17, %s244_s1  ;;  %p249_p8 = scmp.lt.s32.totalorder %s51_s17, %s51_s17 }
  0x30   :  { %p250_p9 = scmp.lt.s32.totalorder %s244_s1, %s244_s1 }
  0x32   :  { %p251_p10 = por %p250_p9, %p249_p8 }
  0x34   :  { %p252_p11 = pnand %p251_p10, %p245_p7 }
  0x36   :  { %255 = shalt.err (!%p252_p11)
}
  0x37   :  { %s291_s2 = smov [#allocation9]  }
  0x38   :  { %53 = dma.vmem_to_smem %s51_s17, 16, %s291_s2, [#allocation10]  }
  0x39   :  { %278 = dma.done.wait [#allocation3], 128  }
  0x3a   :  { %279 = vsyncadd [#allocation3], 4294967168 }
  0x3b   :  { %280 = dma.done.wait [#allocation7], 128  }
  0x3c   :  { %281 = vsyncadd [#allocation7], 4294967168 }
  0x3d   :  { %282 = dma.done.wait [#allocation5], 16  }
  0x3e   :  { %283 = vsyncadd [#allocation5], 4294967280 }
  0x3f   :  { %284 = dma.done.wait [#allocation10], 16  }
  0x40   :  { %285 = vsyncadd [#allocation10], 4294967280 }
  0x41   :  { %66 = sfence }
  0x42   :  { %v68_v0 = vld [vmem:[#allocation6] sm:$0xff]  ;;  %v67_v1 = vld [vmem:[#allocation2] sm:$0xff]  ;;  %vm69_vm0 = vcmask 64512   ;;  %v292_v2 = vmov 0.0   ;;  %vm293_vm1 = vmmov 0   ;;  %s294_s3 = smov [#allocation11]  }
  0x43   :  { %174 = vmatprep.subr.mxu0 %v292_v2  ;;  %176 = vmatprep.mubr.msk.f32.mxu0 %vm293_vm1, %v292_v2  ;;  %s159_s18 = sshll.u32 %s294_s3, 4  ;;  %s160_s18 = int_to_ptr.vmem [resolvable:$true] %s159_s18 }
  0x44   :  { %175 = vmatpush3.msra.mxu0 %v68_v0  ;;  %s256_s21 = scalar_lea.vmem %s160_s18, 128  ;;  %p261_p13 = scmp.lt.s32.totalorder %s160_s18, %s160_s18 }
  0x45   :  { %177 = vmatmul.mubr.msk.f32.vlgmr.msra.gmra.mrb[0].mxu0 %vm69_vm0, %v67_v1  ;;  %p257_p12 = scmp.ne.s32.totalorder %s160_s18, %s256_s21  ;;  %p262_p0 = scmp.lt.s32.totalorder %s256_s21, %s256_s21 }
  0x47   :  { %p263_p1 = por %p262_p0, %p261_p13 }
  0x49   :  { %p264_p2 = pnand %p263_p1, %p257_p12 }
 0x118   :  { %v139_v3 = vpop.f32.mrb[0].mxu0 }
 0x119   :  { %v143_v4 = vand.u32 2147483647, %v139_v3  ;;  %v178_v5 = vpop.f32.mrb[1].mxu0 }
 0x11b   :  { %v144_v6 = vadd.f32 1e-06, %v143_v4 }
 0x11d   :  { %186 = vrcp.f32 %v144_v6 }
 0x127   :  { %v187_v7 = vpop.eup %186 }
 0x128   :  { %v146_v8 = vmul.f32 %v187_v7, %v144_v6 }
 0x12a   :  { %v147_v9 = vsub.f32 2.0, %v146_v8 }
 0x12c   :  { %v148_v10 = vmul.f32 %v187_v7, %v147_v9 }
 0x12e   :  { %v149_v11 = vmul.f32 %v148_v10, %v144_v6 }
 0x130   :  { %v150_v12 = vsub.f32 2.0, %v149_v11 }
 0x132   :  { %v151_v13 = vmul.f32 %v150_v12, %v148_v10 }
 0x134   :  { %152 = vst [vmem:[#allocation11] sm:$0xff] %v151_v13 }
 0x135   :  { %267 = shalt.err (!%p264_p2)
}
 0x136   :  { %s268_s24 = scalar_lea.hbm %s366_s4, 128 }
 0x137   :  { %p269_p3 = scmp.ne.s32.totalorder %s366_s4, %s268_s24  ;;  %p272_p4 = scmp.lt.u32.totalorder %s268_s24, %s366_s4 }
 0x139   :  { %p274_p5 = pnand %p272_p4, %p269_p3 }
 0x13b   :  { %277 = shalt.err (!%p274_p5)
}
 0x13c   :  { %162 = dma.vmem_to_hbm [thread:$0]  %s160_s18, 128, %s366_s4, [#allocation4]  }
 0x13d   :  { %286 = dma.done.wait [#allocation4], 128  }
 0x13e   :  { %287 = vsyncadd [#allocation4], 4294967168 }
 0x13f   :  { %166 = vsyncpa [#allocation3], 1 }
 0x140   :  { %167 = vsyncpa [#allocation7], 1 }
 0x141   :  { %168 = vsyncpa [#allocation4], 1 }
 0x142   :  { %169 = vsyncpa [#allocation5], 1 }
 0x143   :  { %170 = vsyncpa [#allocation10], 1 }

</bundles_post_ra>
